<compile_context>
chip_gen: v6e
topology: v6e:2x2x1
jax: 0.10.0
libtpu: 0.0.40
codegen_flags: <defaults>
</compile_context>

<pallas_src>
import jax
import jax.numpy as jnp
from jax.experimental import pallas as pl
from jax.experimental.pallas import tpu as pltpu

# Minimum second-to-last tile multiple per itemsize (sublane packing).
_SUBLANE = {1: 32, 2: 16, 4: 8}


def _normalize_kernel(x_ref, sb_ref, o_ref):
    # x_ref: (TR, TC) tile of the (N*C, H*W) view of x
    # sb_ref: (TR, 2) f32, column 0 = 1/std, column 1 = -mean/std
    x = x_ref[...].astype(jnp.float32)
    scale = sb_ref[:, 0:1]   # (TR, 1) broadcast across lanes
    bias = sb_ref[:, 1:2]    # (TR, 1)
    o_ref[...] = (x * scale + bias).astype(o_ref.dtype)


def _choose_tiles(rows, cols, itemsize, sub, tile_bytes, col_tile=4096):
    """Prefer full-width (fully contiguous DMA) row tiles; 2-D fallback for huge H*W."""
    min_rows = rows if rows <= sub else sub
    if cols * itemsize * min_rows <= tile_bytes:
        if rows <= sub:
            tr = rows  # full extent -> always a legal block
        else:
            tr = min(rows, max(sub, (tile_bytes // (cols * itemsize)) // sub * sub))
        return tr, cols, True
    # Very large H*W: 2-D lane-dense tiling (tc multiple of 128).
    tc = min(cols, col_tile)
    if rows <= sub:
        tr = rows
    else:
        tr = min(rows, max(sub, (tile_bytes // (tc * itemsize)) // sub * sub))
    return tr, tc, False


def normalize(x, mean, std, *, tile_bytes=4 << 20, in_place=False):
    """(x - mean[:, None, None]) / std[:, None, None] for NCHW x (PyTorch Normalize).

    NOTE: the (N*C, H*W) view assumes contiguous NCHW layout; per-channel stats
    are tiled as jnp.tile(stat, N) so row n*C + c gets channel c's stats.
    """
    N, C, H, W = x.shape
    rows, cols = N * C, H * W

    # PyTorch Normalize returns a floating tensor; never truncate to int dtypes.
    out_dtype = x.dtype if jnp.issubdtype(x.dtype, jnp.floating) else jnp.float32

    x2 = x.reshape(rows, cols)

    mean_f32 = jnp.asarray(mean, dtype=jnp.float32).reshape(-1)
    std_f32 = jnp.asarray(std, dtype=jnp.float32).reshape(-1)
    inv_std = 1.0 / std_f32
    # Fused per-row scale/bias: y = x * (1/std) + (-mean/std)
    scale_bias = jnp.stack(
        [jnp.tile(inv_std, N), jnp.tile(-mean_f32 * inv_std, N)], axis=-1
    )  # (rows, 2) f32

    in_item = jnp.dtype(x.dtype).itemsize
    out_item = jnp.dtype(out_dtype).itemsize
    itemsize = max(in_item, out_item)
    sub = max(_SUBLANE.get(in_item, 8), _SUBLANE.get(out_item, 8))

    tr, tc, full_width = _choose_tiles(rows, cols, itemsize, sub, tile_bytes)

    if full_width:
        # 1-D grid over row tiles; every input/output DMA is fully contiguous.
        grid = (pl.cdiv(rows, tr),)
        x_spec = pl.BlockSpec((tr, cols), lambda i: (i, 0))
        sb_spec = pl.BlockSpec((tr, 2), lambda i: (i, 0))
        o_spec = pl.BlockSpec((tr, cols), lambda i: (i, 0))
        dims = ("parallel",)
    else:
        # Row axis outer so the tiny (tr, 2) stats block is constant across
        # the inner column sweep (no re-DMA).
        grid = (pl.cdiv(rows, tr), pl.cdiv(cols, tc))
        x_spec = pl.BlockSpec((tr, tc), lambda i, j: (i, j))
        sb_spec = pl.BlockSpec((tr, 2), lambda i, j: (i, 0))
        o_spec = pl.BlockSpec((tr, tc), lambda i, j: (i, j))
        dims = ("parallel", "parallel")

    aliases = {}
    if in_place and out_dtype == x.dtype:
        aliases = {0: 0}  # write result over x2's buffer (caller donates x)

    out2 = pl.pallas_call(
        _normalize_kernel,
        out_shape=jax.ShapeDtypeStruct((rows, cols), out_dtype),
        grid_spec=pl.GridSpec(
            grid=grid,
            in_specs=[x_spec, sb_spec],
            out_specs=o_spec,
        ),
        compiler_params=pltpu.CompilerParams(
            dimension_semantics=dims,
            # ~4 MiB double-buffered in + out (~16 MiB) needs more than v5e's
            # 16 MiB scoped default; 48 MiB stays under v7x's 64 MiB physical.
            vmem_limit_bytes=48 << 20,
        ),
        cost_estimate=pl.CostEstimate(
            flops=2 * rows * cols,
            transcendentals=0,
            bytes_accessed=rows * cols * (in_item + out_item) + rows * 2 * 4,
        ),
        input_output_aliases=aliases,
    )(x2, scale_bias)

    return out2.reshape(N, C, H, W)


if __name__ == "__main__":
    key = jax.random.PRNGKey(0)
    N, C, H, W = 2, 4, 16, 16

    x = jax.random.normal(key, (N, C, H, W), dtype=jnp.float32)
    # Deterministic "buffer" init (module __init__ takes mean/std of length C).
    mean = jnp.array([0.1, 0.2, 0.3, 0.4], dtype=jnp.float32)
    std = jnp.array([0.5, 0.6, 0.7, 0.8], dtype=jnp.float32)

    out = jax.block_until_ready(normalize(x, mean, std))
    ref = (x - mean.reshape(-1, 1, 1)) / std.reshape(-1, 1, 1)
    assert out.shape == (N, C, H, W)
    assert out.dtype == jnp.float32
    assert jnp.allclose(out, ref, atol=1e-5, rtol=1e-5)

    # Odd-row case (rows = N*C = 3 -> full-extent row block, still legal).
    x3 = jax.random.normal(jax.random.PRNGKey(1), (1, 3, 16, 16), dtype=jnp.float32)
    m3 = jnp.array([0.485, 0.456, 0.406], dtype=jnp.float32)
    s3 = jnp.array([0.229, 0.224, 0.225], dtype=jnp.float32)
    out3 = jax.block_until_ready(normalize(x3, m3, s3))
    ref3 = (x3 - m3.reshape(-1, 1, 1)) / s3.reshape(-1, 1, 1)
    assert jnp.allclose(out3, ref3, atol=1e-5, rtol=1e-5)

    print("KERNEL_OK")
</pallas_src>

<mosaic_0001>
module attributes {stable_mosaic.version = 11 : i64} {
  func.func @_normalize_kernel(%arg0: i32, %arg1: memref<8x256xf32, #tpu.memory_space<vmem>>, %arg2: memref<8x2xf32, #tpu.memory_space<vmem>>, %arg3: memref<8x256xf32, #tpu.memory_space<vmem>>) attributes {dimension_semantics = [#tpu.dimension_semantics<parallel>], iteration_bounds = array<i64: 1>, scalar_prefetch = 0 : i64, scratch_operands = 0 : i64, tpu.core_type = #tpu.core_type<tc>, window_params = [{transform_indices = @transform_0, window_bounds = array<i64: 8, 256>}, {transform_indices = @transform_1, window_bounds = array<i64: 8, 2>}, {transform_indices = @transform_2, window_bounds = array<i64: 8, 256>}]} {
    %c0 = arith.constant 0 : index
    %c0_0 = arith.constant 0 : index
    %0 = vector.load %arg1[%c0, %c0_0] : memref<8x256xf32, #tpu.memory_space<vmem>>, vector<8x256xf32>
    %c0_1 = arith.constant 0 : index
    %c0_2 = arith.constant 0 : index
    %1 = vector.load %arg2[%c0_1, %c0_2] : memref<8x2xf32, #tpu.memory_space<vmem>>, vector<8x1xf32>
    %c0_3 = arith.constant 0 : index
    %c1 = arith.constant 1 : index
    %2 = vector.load %arg2[%c0_3, %c1] : memref<8x2xf32, #tpu.memory_space<vmem>>, vector<8x1xf32>
    %3 = vector.broadcast %1 : vector<8x1xf32> to vector<8x256xf32>
    %4 = arith.mulf %0, %3 : vector<8x256xf32>
    %5 = vector.broadcast %2 : vector<8x1xf32> to vector<8x256xf32>
    %6 = arith.addf %4, %5 : vector<8x256xf32>
    %c0_4 = arith.constant 0 : index
    %c0_5 = arith.constant 0 : index
    %7 = vector.load %arg3[%c0_4, %c0_5] : memref<8x256xf32, #tpu.memory_space<vmem>>, vector<8x256xf32>
    tpu.vector_store %arg3[%c0_4, %c0_5], %6 {strides = array<i32>} : memref<8x256xf32, #tpu.memory_space<vmem>>, vector<8x256xf32>,
    return
  }
  func.func @transform_0(%arg0: i32) -> (i32, i32) {
    %c0_i32 = arith.constant 0 : i32
    %c0_i32_0 = arith.constant 0 : i32
    return %arg0, %c0_i32 : i32, i32
  }
  func.func @transform_1(%arg0: i32) -> (i32, i32) {
    %c0_i32 = arith.constant 0 : i32
    %c0_i32_0 = arith.constant 0 : i32
    return %arg0, %c0_i32 : i32, i32
  }
  func.func @transform_2(%arg0: i32) -> (i32, i32) {
    %c0_i32 = arith.constant 0 : i32
    %c0_i32_0 = arith.constant 0 : i32
    return %arg0, %c0_i32 : i32, i32
  }
}

</mosaic_0001>

<bundles_post_ra>
// kernel: tpu_custom_call.1
= control target key start
LH: loop header
LB: loop body
LE: loop exit
PB: predicated region body
PF: predicated region fallthrough
CT: control target
= control target key end

     0   :  { %7 = vsyncpa [#allocation3], 0  ;;  %s135_s0 = inlined_call_operand.hbm [shape: f32[8,256], index: 0, kind: input, shape index: {}]   ;;  %s136_s1 = inlined_call_operand.vmem [shape: f32[8,2], index: 1, kind: input, shape index: {}]   ;;  %s137_s2 = inlined_call_operand.hbm [shape: f32[8,256], index: 2, kind: output, shape index: {}]  }
   0x1   :  { %8 = vsyncpa [#allocation4], 0  ;;  %s107_s9 = smov [#allocation2]  }
   0x2   :  { %s15_s10 = sshll.u32 %s107_s9, 4  ;;  %s16_s10 = int_to_ptr.vmem [resolvable:$true] %s15_s10 }
   0x3   :  { %s71_s11 = scalar_lea.vmem %s16_s10, 256  ;;  %p76_p1 = scmp.lt.s32.totalorder %s16_s10, %s16_s10 }
   0x4   :  { %p72_p0 = scmp.ne.s32.totalorder %s16_s10, %s71_s11  ;;  %p77_p2 = scmp.lt.s32.totalorder %s71_s11, %s71_s11 }
   0x6   :  { %p78_p3 = por %p77_p2, %p76_p1 }
   0x8   :  { %p79_p4 = pnand %p78_p3, %p72_p0 }
   0xa   :  { %82 = shalt.err (!%p79_p4)
}
   0xb   :  { %18 = dma.hbm_to_vmem [thread:$0]  %s135_s0, 256, %s16_s10, [#allocation3]  }
   0xc   :  { %103 = dma.done.wait [#allocation3], 256  }
   0xd   :  { %104 = vsyncadd [#allocation3], 4294967040  ;;  %v108_v0 = vmov 0   ;;  %v26_v1 = vld [vmem:[%s136_s1] sm:$0xff]  ;;  %v109_v2 = vmov 1   ;;  %v25_v5 = vld [vmem:[#allocation2 + $0x8] sm:$0xff] }
   0xe   :  { %61 = vset.pattern.permute.xlu0 %v108_v0  ;;  %v24_v4 = vld [vmem:[#allocation2] sm:$0xff]  ;;  %s110_s16 = smov [#allocation5]  }
   0xf   :  { %29 = vperm.xlu0 %61, %v26_v1   ;;  %s48_s17 = sshll.u32 %s110_s16, 4  ;;  %s49_s17 = int_to_ptr.vmem [resolvable:$true] %s48_s17 }
  0x10   :  { %s83_s0 = scalar_lea.vmem %s49_s17, 256  ;;  %p88_p6 = scmp.lt.s32.totalorder %s49_s17, %s49_s17 }
  0x11   :  { %p84_p5 = scmp.ne.s32.totalorder %s49_s17, %s83_s0  ;;  %p89_p7 = scmp.lt.s32.totalorder %s83_s0, %s83_s0 }
  0x13   :  { %62 = vset.pattern.permute.xlu0 %v109_v2  ;;  %p90_p8 = por %p89_p7, %p88_p6 }
  0x14   :  { %35 = vperm.xlu0 %62, %v26_v1  }
  0x15   :  { %p91_p9 = pnand %p90_p8, %p84_p5 }
  0x8a   :  { %v30_v3 = vpop.permute.xlu0 %29 }
  0x8b   :  { %v32_v6 = vmul.f32 %v30_v3, %v24_v4  ;;  %v33_v7 = vmul.f32 %v30_v3, %v25_v5 }
  0x8f   :  { %v36_v8 = vpop.permute.xlu0 %35 }
  0x90   :  { %v38_v9 = vadd.f32 %v36_v8, %v32_v6  ;;  %v39_v10 = vadd.f32 %v36_v8, %v33_v7 }
  0x92   :  { %40 = vst [vmem:[#allocation5] sm:$0xff] %v38_v9  ;;  %41 = vst [vmem:[#allocation5 + $0x8] sm:$0xff] %v39_v10 }
  0x93   :  { %94 = shalt.err (!%p91_p9)
}
  0x94   :  { %51 = dma.vmem_to_hbm [thread:$0]  %s49_s17, 256, %s137_s2, [#allocation4]  }
  0x95   :  { %105 = dma.done.wait [#allocation4], 256  }
  0x96   :  { %106 = vsyncadd [#allocation4], 4294967040 }
  0x97   :  { %55 = vsyncpa [#allocation3], 1 }
  0x98   :  { %56 = vsyncpa [#allocation4], 1 }

</bundles_post_ra>
